<compile_context>
chip_gen: v6e
topology: v6e:2x2x1
jax: 0.10.0
libtpu: 0.0.40
codegen_flags: <defaults>
</compile_context>

<pallas_src>
import jax
import jax.numpy as jnp
from jax.experimental import pallas as pl
from jax.experimental.pallas import tpu as pltpu


def hypanet_kernel(x_ref, w1_ref, b1_ref, w2_ref, b2_ref, w3_ref, b3_ref, o_ref):
    x = x_ref[0]                      # (Cin, ts)  -- pixels on the lane axis
    w1 = w1_ref[...]                  # (Cmid, Cin)
    cin = x.shape[0]

    # Layer 1 (+ ReLU): K == Cin is tiny (2); skip the MXU and do rank-1
    # broadcast-MACs on the VPU:  h[c, p] = b1[c] + sum_k w1[c, k] * x[k, p]
    h = b1_ref[...]                   # (Cmid, 1) broadcasts over lanes
    for k in range(cin):              # static unroll (Cin is small)
        h = h + w1[:, k:k + 1] * x[k:k + 1, :]
    h = jnp.maximum(h, 0.0)           # (Cmid, ts)

    # Layer 2 (+ ReLU): (Cmid, Cmid) @ (Cmid, ts) on the MXU, f32 accumulation.
    h = jnp.dot(w2_ref[...], h, preferred_element_type=jnp.float32) + b2_ref[...]
    h = jnp.maximum(h, 0.0)

    # Layer 3 + Softplus (beta=1, threshold=20, matches torch.nn.Softplus) + 1e-6.
    z = jnp.dot(w3_ref[...], h, preferred_element_type=jnp.float32) + b3_ref[...]
    sp = jnp.where(z > 20.0, z, jnp.log1p(jnp.exp(jnp.minimum(z, 20.0))))
    o_ref[0] = (sp + 1e-6).astype(o_ref.dtype)   # (Cout, ts) lane-dense store


def hypanet_forward(x_nchw, params, *, ts_max=2048):
    """x_nchw: (N, in_nc, H, W) float32. Returns (N, out_nc, H, W)."""
    w1, b1, w2, b2, w3, b3 = params
    N, Cin, H, W = x_nchw.shape
    Cmid = w1.shape[0]
    Cout = w3.shape[0]
    HW = H * W

    # Spatial tile: multiple of 128, at most ts_max; pad HW up to a tile multiple.
    ts = min(ts_max, pl.cdiv(HW, 128) * 128)
    HWp = pl.cdiv(HW, ts) * ts

    x3 = x_nchw.reshape(N, Cin, HW)
    if HWp != HW:
        x3 = jnp.pad(x3, ((0, 0), (0, 0), (0, HWp - HW)))

    grid = (N, HWp // ts)
    out = pl.pallas_call(
        hypanet_kernel,
        out_shape=jax.ShapeDtypeStruct((N, Cout, HWp), x_nchw.dtype),
        grid_spec=pltpu.PrefetchScalarGridSpec(
            num_scalar_prefetch=0,
            grid=grid,
            in_specs=[
                pl.BlockSpec((1, Cin, ts), lambda n, s: (n, 0, s)),   # x tile
                pl.BlockSpec((Cmid, Cin), lambda n, s: (0, 0)),       # w1 (resident)
                pl.BlockSpec((Cmid, 1), lambda n, s: (0, 0)),         # b1
                pl.BlockSpec((Cmid, Cmid), lambda n, s: (0, 0)),      # w2 (resident)
                pl.BlockSpec((Cmid, 1), lambda n, s: (0, 0)),         # b2
                pl.BlockSpec((Cout, Cmid), lambda n, s: (0, 0)),      # w3 (resident)
                pl.BlockSpec((Cout, 1), lambda n, s: (0, 0)),         # b3
            ],
            out_specs=pl.BlockSpec((1, Cout, ts), lambda n, s: (n, 0, s)),
        ),
        compiler_params=pltpu.CompilerParams(
            dimension_semantics=("parallel", "parallel")),
    )(x3, w1, b1, w2, b2, w3, b3)

    if HWp != HW:
        out = out[:, :, :HW]
    return out.reshape(N, Cout, H, W)


def init_params(key, in_nc=2, out_nc=8, channel=64):
    """Deterministic synthetic init. A 1x1 Conv2d weight (Cout, Cin, 1, 1) is
    stored as a (Cout, Cin) matrix; biases as (C, 1) columns (broadcast over
    the lane/pixel axis)."""
    k1, k2, k3, k4, k5, k6 = jax.random.split(key, 6)
    w1 = jax.random.normal(k1, (channel, in_nc), jnp.float32) * 0.1
    b1 = jax.random.normal(k2, (channel, 1), jnp.float32) * 0.1
    w2 = jax.random.normal(k3, (channel, channel), jnp.float32) * 0.1
    b2 = jax.random.normal(k4, (channel, 1), jnp.float32) * 0.1
    w3 = jax.random.normal(k5, (out_nc, channel), jnp.float32) * 0.1
    b3 = jax.random.normal(k6, (out_nc, 1), jnp.float32) * 0.1
    return (w1, b1, w2, b2, w3, b3)


def hypanet_ref(x_nchw, params):
    """Pure-JAX reference matching the PyTorch forward."""
    w1, b1, w2, b2, w3, b3 = params
    N, Cin, H, W = x_nchw.shape
    x = x_nchw.reshape(N, Cin, H * W)
    h = jax.nn.relu(jnp.einsum('oi,nis->nos', w1, x) + b1[None])
    h = jax.nn.relu(jnp.einsum('oi,nis->nos', w2, h) + b2[None])
    z = jnp.einsum('oi,nis->nos', w3, h) + b3[None]
    y = jax.nn.softplus(z) + 1e-6
    return y.reshape(N, -1, H, W)


if __name__ == "__main__":
    key = jax.random.PRNGKey(0)
    kx, kp = jax.random.split(key)

    in_nc, out_nc, channel = 2, 8, 64
    N, H, W = 2, 16, 16

    x = jax.random.normal(kx, (N, in_nc, H, W), jnp.float32)
    params = init_params(kp, in_nc=in_nc, out_nc=out_nc, channel=channel)

    y = hypanet_forward(x, params)
    y = jax.block_until_ready(y)

    y_ref = hypanet_ref(x, params)
    assert y.shape == (N, out_nc, H, W)
    assert jnp.allclose(y, y_ref, atol=1e-5, rtol=1e-5), "mismatch vs reference"

    print("KERNEL_OK")
</pallas_src>

<mosaic_0001>
module attributes {stable_mosaic.version = 11 : i64} {
  func.func @hypanet_kernel(%arg0: i32, %arg1: i32, %arg2: memref<1x2x256xf32, #tpu.memory_space<vmem>>, %arg3: memref<64x2xf32, #tpu.memory_space<vmem>>, %arg4: memref<64x1xf32, #tpu.memory_space<vmem>>, %arg5: memref<64x64xf32, #tpu.memory_space<vmem>>, %arg6: memref<64x1xf32, #tpu.memory_space<vmem>>, %arg7: memref<8x64xf32, #tpu.memory_space<vmem>>, %arg8: memref<8x1xf32, #tpu.memory_space<vmem>>, %arg9: memref<1x8x256xf32, #tpu.memory_space<vmem>>) attributes {dimension_semantics = [#tpu.dimension_semantics<parallel>, #tpu.dimension_semantics<parallel>], iteration_bounds = array<i64: 2, 1>, scalar_prefetch = 0 : i64, scratch_operands = 0 : i64, tpu.core_type = #tpu.core_type<tc>, window_params = [{transform_indices = @transform_0, window_bounds = array<i64: 1, 2, 256>}, {pipeline_mode = #tpu.pipeline_mode<synchronous>, transform_indices = @transform_1, window_bounds = array<i64: 64, 2>}, {pipeline_mode = #tpu.pipeline_mode<synchronous>, transform_indices = @transform_2, window_bounds = array<i64: 64, 1>}, {pipeline_mode = #tpu.pipeline_mode<synchronous>, transform_indices = @transform_3, window_bounds = array<i64: 64, 64>}, {pipeline_mode = #tpu.pipeline_mode<synchronous>, transform_indices = @transform_4, window_bounds = array<i64: 64, 1>}, {pipeline_mode = #tpu.pipeline_mode<synchronous>, transform_indices = @transform_5, window_bounds = array<i64: 8, 64>}, {pipeline_mode = #tpu.pipeline_mode<synchronous>, transform_indices = @transform_6, window_bounds = array<i64: 8, 1>}, {transform_indices = @transform_7, window_bounds = array<i64: 1, 8, 256>}]} {
    %c0 = arith.constant 0 : index
    %c0_0 = arith.constant 0 : index
    %c0_1 = arith.constant 0 : index
    %0 = vector.load %arg2[%c0, %c0_0, %c0_1] : memref<1x2x256xf32, #tpu.memory_space<vmem>>, vector<1x2x256xf32>
    %1 = vector.shape_cast %0 : vector<1x2x256xf32> to vector<2x256xf32>
    %c0_2 = arith.constant 0 : index
    %c0_3 = arith.constant 0 : index
    %2 = vector.load %arg3[%c0_2, %c0_3] : memref<64x2xf32, #tpu.memory_space<vmem>>, vector<64x2xf32>
    %c0_4 = arith.constant 0 : index
    %c0_5 = arith.constant 0 : index
    %3 = vector.load %arg4[%c0_4, %c0_5] : memref<64x1xf32, #tpu.memory_space<vmem>>, vector<64x1xf32>
    %4 = vector.extract_strided_slice %2 {offsets = [0, 0], sizes = [64, 1], strides = [1, 1]} : vector<64x2xf32> to vector<64x1xf32>
    %5 = vector.extract_strided_slice %1 {offsets = [0, 0], sizes = [1, 256], strides = [1, 1]} : vector<2x256xf32> to vector<1x256xf32>
    %6 = vector.broadcast %4 : vector<64x1xf32> to vector<64x256xf32>
    %7 = vector.broadcast %5 : vector<1x256xf32> to vector<64x256xf32>
    %8 = arith.mulf %6, %7 : vector<64x256xf32>
    %9 = vector.broadcast %3 : vector<64x1xf32> to vector<64x256xf32>
    %10 = arith.addf %9, %8 : vector<64x256xf32>
    %11 = vector.extract_strided_slice %2 {offsets = [0, 1], sizes = [64, 1], strides = [1, 1]} : vector<64x2xf32> to vector<64x1xf32>
    %12 = vector.extract_strided_slice %1 {offsets = [1, 0], sizes = [1, 256], strides = [1, 1]} : vector<2x256xf32> to vector<1x256xf32>
    %13 = vector.broadcast %11 : vector<64x1xf32> to vector<64x256xf32>
    %14 = vector.broadcast %12 : vector<1x256xf32> to vector<64x256xf32>
    %15 = arith.mulf %13, %14 : vector<64x256xf32>
    %16 = arith.addf %10, %15 : vector<64x256xf32>
    %cst = arith.constant 0.000000e+00 : f32
    %17 = vector.broadcast %cst : f32 to vector<64x256xf32>
    %18 = arith.maximumf %16, %17 : vector<64x256xf32>
    %c0_6 = arith.constant 0 : index
    %c0_7 = arith.constant 0 : index
    %19 = vector.load %arg5[%c0_6, %c0_7] : memref<64x64xf32, #tpu.memory_space<vmem>>, vector<64x64xf32>
    %cst_8 = arith.constant dense<0.000000e+00> : vector<64x256xf32>
    %20 = tpu.matmul %19, %18, %cst_8 {dimension_numbers = #tpu.dot_dimension_numbers<[1], [0], [0], [1], [0, 0, 1, 1], [], []>} : vector<64x64xf32>, vector<64x256xf32>, vector<64x256xf32> -> vector<64x256xf32>
    %c0_9 = arith.constant 0 : index
    %c0_10 = arith.constant 0 : index
    %21 = vector.load %arg6[%c0_9, %c0_10] : memref<64x1xf32, #tpu.memory_space<vmem>>, vector<64x1xf32>
    %22 = vector.broadcast %21 : vector<64x1xf32> to vector<64x256xf32>
    %23 = arith.addf %20, %22 : vector<64x256xf32>
    %cst_11 = arith.constant 0.000000e+00 : f32
    %24 = vector.broadcast %cst_11 : f32 to vector<64x256xf32>
    %25 = arith.maximumf %23, %24 : vector<64x256xf32>
    %c0_12 = arith.constant 0 : index
    %c0_13 = arith.constant 0 : index
    %26 = vector.load %arg7[%c0_12, %c0_13] : memref<8x64xf32, #tpu.memory_space<vmem>>, vector<8x64xf32>
    %cst_14 = arith.constant dense<0.000000e+00> : vector<8x256xf32>
    %27 = tpu.matmul %26, %25, %cst_14 {dimension_numbers = #tpu.dot_dimension_numbers<[1], [0], [0], [1], [0, 0, 1, 1], [], []>} : vector<8x64xf32>, vector<64x256xf32>, vector<8x256xf32> -> vector<8x256xf32>
    %c0_15 = arith.constant 0 : index
    %c0_16 = arith.constant 0 : index
    %28 = vector.load %arg8[%c0_15, %c0_16] : memref<8x1xf32, #tpu.memory_space<vmem>>, vector<8x1xf32>
    %29 = vector.broadcast %28 : vector<8x1xf32> to vector<8x256xf32>
    %30 = arith.addf %27, %29 : vector<8x256xf32>
    %cst_17 = arith.constant 2.000000e+01 : f32
    %31 = vector.broadcast %cst_17 : f32 to vector<8x256xf32>
    %32 = arith.cmpf ogt, %30, %31 : vector<8x256xf32>
    %cst_18 = arith.constant 2.000000e+01 : f32
    %33 = vector.broadcast %cst_18 : f32 to vector<8x256xf32>
    %34 = arith.minimumf %30, %33 : vector<8x256xf32>
    %35 = math.exp %34 : vector<8x256xf32>
    %36 = math.log1p %35 : vector<8x256xf32>
    %37 = arith.select %32, %30, %36 : vector<8x256xi1>, vector<8x256xf32>
    %cst_19 = arith.constant 9.99999997E-7 : f32
    %38 = vector.broadcast %cst_19 : f32 to vector<8x256xf32>
    %39 = arith.addf %37, %38 : vector<8x256xf32>
    %c0_20 = arith.constant 0 : index
    %c0_21 = arith.constant 0 : index
    %c0_22 = arith.constant 0 : index
    %40 = vector.load %arg9[%c0_20, %c0_21, %c0_22] : memref<1x8x256xf32, #tpu.memory_space<vmem>>, vector<1x8x256xf32>
    %41 = vector.shape_cast %40 : vector<1x8x256xf32> to vector<8x256xf32>
    %42 = vector.shape_cast %39 : vector<8x256xf32> to vector<1x8x256xf32>
    tpu.vector_store %arg9[%c0_20, %c0_21, %c0_22], %42 {strides = array<i32>} : memref<1x8x256xf32, #tpu.memory_space<vmem>>, vector<1x8x256xf32>,
    return
  }
  func.func @transform_0(%arg0: i32, %arg1: i32) -> (i32, i32, i32) {
    %c0_i32 = arith.constant 0 : i32
    %c0_i32_0 = arith.constant 0 : i32
    return %arg0, %c0_i32, %arg1 : i32, i32, i32
  }
  func.func @transform_1(%arg0: i32, %arg1: i32) -> (i32, i32) {
    %c0_i32 = arith.constant 0 : i32
    %c0_i32_0 = arith.constant 0 : i32
    %c0_i32_1 = arith.constant 0 : i32
    return %c0_i32, %c0_i32_0 : i32, i32
  }
  func.func @transform_2(%arg0: i32, %arg1: i32) -> (i32, i32) {
    %c0_i32 = arith.constant 0 : i32
    %c0_i32_0 = arith.constant 0 : i32
    %c0_i32_1 = arith.constant 0 : i32
    return %c0_i32, %c0_i32_0 : i32, i32
  }
  func.func @transform_3(%arg0: i32, %arg1: i32) -> (i32, i32) {
    %c0_i32 = arith.constant 0 : i32
    %c0_i32_0 = arith.constant 0 : i32
    %c0_i32_1 = arith.constant 0 : i32
    return %c0_i32, %c0_i32_0 : i32, i32
  }
  func.func @transform_4(%arg0: i32, %arg1: i32) -> (i32, i32) {
    %c0_i32 = arith.constant 0 : i32
    %c0_i32_0 = arith.constant 0 : i32
    %c0_i32_1 = arith.constant 0 : i32
    return %c0_i32, %c0_i32_0 : i32, i32
  }
  func.func @transform_5(%arg0: i32, %arg1: i32) -> (i32, i32) {
    %c0_i32 = arith.constant 0 : i32
    %c0_i32_0 = arith.constant 0 : i32
    %c0_i32_1 = arith.constant 0 : i32
    return %c0_i32, %c0_i32_0 : i32, i32
  }
  func.func @transform_6(%arg0: i32, %arg1: i32) -> (i32, i32) {
    %c0_i32 = arith.constant 0 : i32
    %c0_i32_0 = arith.constant 0 : i32
    %c0_i32_1 = arith.constant 0 : i32
    return %c0_i32, %c0_i32_0 : i32, i32
  }
  func.func @transform_7(%arg0: i32, %arg1: i32) -> (i32, i32, i32) {
    %c0_i32 = arith.constant 0 : i32
    %c0_i32_0 = arith.constant 0 : i32
    return %arg0, %c0_i32, %arg1 : i32, i32, i32
  }
}

</mosaic_0001>

<bundles_post_ra>
// kernel: tpu_custom_call.1
= control target key start
LH: loop header
LB: loop body
LE: loop exit
PB: predicated region body
PF: predicated region fallthrough
CT: control target
= control target key end

     0   :  { %12 = vsyncpa [#allocation3], 0  ;;  %s1455_s0 = inlined_call_operand.vmem [shape: f32[2,2,256], index: 0, kind: input, shape index: {}]   ;;  %s1456_s1 = inlined_call_operand.vmem [shape: f32[64,2], index: 1, kind: input, shape index: {}]   ;;  %s1457_s2 = inlined_call_operand.vmem [shape: f32[64,1], index: 2, kind: input, shape index: {}]   ;;  %s1458_s3 = inlined_call_operand.vmem [shape: f32[64,64], index: 3, kind: input, shape index: {}]   ;;  %s1459_s4 = inlined_call_operand.vmem [shape: f32[64,1], index: 4, kind: input, shape index: {}]   ;;  %s1460_s5 = inlined_call_operand.vmem [shape: f32[8,64], index: 5, kind: input, shape index: {}]   ;;  %s1461_s6 = inlined_call_operand.vmem [shape: f32[8,1], index: 6, kind: input, shape index: {}]   ;;  %s1462_s7 = inlined_call_operand.hbm [shape: f32[2,8,256], index: 7, kind: output, shape index: {}]  }
   0x1   :  { %14 = vsyncpa [#allocation3 + $0x1], 0  ;;  %s1192_s24 = smov 0   ;;  %s1194_s25 = smov 0  }
   0x2   :  { %s1196_s26 = smov 0   ;;  %s1198_s27 = smov 0  }
   0x3   :  { %s1200_s28 = smov 0   ;;  %s1202_s29 = smov 0  }
   0x4 LB: > { %s970_s30 = sadd.s32 4294967295, %s1146_s29   ;;  %s971_s8 = sadd.s32 4294967294, %s1146_s29   ;;  %s1146_s29 = sphi %s1202_s29, %s20_s29   ;;  %s1142_s28 = sphi %s1200_s28, %s1469_s28   ;;  %s1138_s27 = sphi %s1198_s27, %s1468_s27   ;;  %s1134_s26 = sphi %s1196_s26, %s1467_s26   ;;  %s1130_s25 = sphi %s1194_s25, %s1466_s25   ;;  %s1126_s24 = sphi %s1192_s24, %s1465_s24  }
   0x5   : > { %s32_s9 = sadd.s32 1, %s1142_s28  ;;  %s195_s10 = sadd.s32 1, %s1134_s26 }
   0x6   : > { %p34_p0 = scmp.ge.s32.totalorder %s32_s9, 2  ;;  %p205_p1 = scmp.ne.s32.totalorder %s1134_s26, %s1130_s25 }
   0x7   : > { %p206_p2 = scmp.eq.s32.totalorder %s970_s30, 1  ;;  %p211_p3 = scmp.ne.s32.totalorder %s1130_s25, %s1126_s24 }
   0x8   : > { %s1471_s9 = smov (%p34_p0, %s32_s9), 0  ;;  %p212_p5 = scmp.eq.s32.totalorder %s971_s8, 1 }
   0x9   : > { %p1232_p4 = por %p206_p2, %p205_p1  ;;  %s190_s12 = ssub.s32 %s1142_s28, %s1471_s9 }
   0xa   : > { %p974_p6 = scmp.ge.s32.totalorder %s1146_s29, 1  ;;  %p193_p7 = scmp.eq.s32.totalorder %s190_s12, 0 }
   0xb   : > { %p1239_p8 = por %p212_p5, %p211_p3  ;;  %p261_p9 = scmp.lt.s32.totalorder %s1146_s29, 3 }
   0xc   : > { %s1245_s14 = scalar_select %p193_p7, %s1134_s26, %s195_s10  }
   0xd   : > { %p262_p10 = pnand %p974_p6, %p261_p9 }
   0xe   : > { %p298_p11 = scmp.lt.s32.totalorder (!%p262_p10), %s1138_s27, 1  ;;  %s294_s23 = sand.u32 (!%p262_p10), 1, %s1130_s25  }
   0xf   : > { %265 = sbr.rel (%p262_p10) target bundleno = 701 (0x2bd), region = 48  ;;  %s975_s30 = sshll.u32 (!%p262_p10), %s294_s23, 4 }
  0x10   : > { %s993_s8 = sshll.u32 (!%p262_p10), %s1138_s27, 8  ;;  %s878_s18 = scalar_lea.sflag (!%p262_p10), [#allocation3], %s294_s23 }
  0x14   : > { %v324_v0 = vld [vmem:[%s1457_s2 + $0x38] sm:$0xff]  ;;  %v1148_v2 = vmov 0   ;;  %v315_v3 = vld [vmem:[%s1456_s1 + $0x30] sm:$0xff]  ;;  %v1149_v4 = vmov 1   ;;  %v314_v5 = vld [vmem:[%s1456_s1 + $0x28] sm:$0xff]  ;;  %v1150_v19 = vmov 0.0   ;;  %v366_v28 = vlaneseq }
  0x15   : > { %v316_v1 = vld [vmem:[%s1456_s1 + $0x38] sm:$0xff]  ;;  %1053 = vset.pattern.permute.xlu1 %v1148_v2  ;;  %1052 = vset.pattern.permute.xlu0 %v1148_v2  ;;  %v323_v6 = vld [vmem:[%s1457_s2 + $0x30] sm:$0xff]  ;;  %v321_v7 = vld [vmem:[%s1457_s2 + $0x20] sm:$0xff]  ;;  %s299_s10 = scalar_select %p298_p11, %s1138_s27, 1  ;;  %vm610_vm0 = vcmask 523264  }
  0x16   : > { %437 = vperm.xlu1 %1053, %v324_v0   ;;  %362 = vperm.xlu0 %1052, %v316_v1   ;;  %v313_v8 = vld [vmem:[%s1456_s1 + $0x20] sm:$0xff]  ;;  %v320_v9 = vld [vmem:[%s1457_s2 + $0x18] sm:$0xff]  ;;  %v322_v10 = vld [vmem:[%s1457_s2 + $0x28] sm:$0xff]  ;;  %v367_v29 = vshrl.u32 %v366_v28, 7  ;;  %s1151_s27 = smov [#allocation2]  }
  0x17   : > { %v310_v11 = vld [vmem:[%s1456_s1 + $0x8] sm:$0xff]  ;;  %v312_v12 = vld [vmem:[%s1456_s1 + $0x18] sm:$0xff]  ;;  %v311_v13 = vld [vmem:[%s1456_s1 + $0x10] sm:$0xff]  ;;  %699 = vmatprep.mubr.f32.mxu0 %v1150_v19  ;;  %838 = vmatprep.mubr.f32.mxu1 %v1150_v19  ;;  %s992_s12 = sshll.u32 %s299_s10, 2  ;;  %s296_s10 = scalar_lea.vmem [#allocation2], %s975_s30 }
  0x18   : > { %v309_v14 = vld [vmem:[%s1456_s1] sm:$0xff]  ;;  %v319_v15 = vld [vmem:[%s1457_s2 + $0x10] sm:$0xff]  ;;  %v318_v16 = vld [vmem:[%s1457_s2 + $0x8] sm:$0xff]  ;;  %s305_s17 = scalar_lea.vmem %s1455_s0, %s992_s12  ;;  %v368_v30 = vsub.s32 0, %v367_v29  ;;  %v372_v31 = vsub.s32 2, %v367_v29  ;;  %v490_v35 = vsub.s32 1, %v367_v29 }
  0x19   : > { %v317_v17 = vld [vmem:[%s1457_s2] sm:$0xff]  ;;  %v569_v18 = vld [vmem:[%s1459_s4 + $0x38] sm:$0xff]  ;;  %v567_v20 = vld [vmem:[%s1459_s4 + $0x28] sm:$0xff]  ;;  %v494_v36 = vsub.s32 3, %v367_v29  ;;  %s894_s12 = sshll.u32 %s296_s10, 4  ;;  %s1074_s20 = sshll.u32 %s1151_s27, 4  ;;  %s895_s12 = int_to_ptr.vmem [resolvable:$true] %s894_s12  ;;  %s1075_s20 = int_to_ptr.vmem [resolvable:$false] %s1074_s20 }
  0x1a   : > { %1054 = vset.pattern.permute.xlu1 %v1149_v4  ;;  %357 = vperm.xlu0 %1052, %v315_v3   ;;  %v566_v21 = vld [vmem:[%s1459_s4 + $0x20] sm:$0xff]  ;;  %v564_v22 = vld [vmem:[%s1459_s4 + $0x10] sm:$0xff]  ;;  %v565_v25 = vld [vmem:[%s1459_s4 + $0x18] sm:$0xff]  ;;  %s1070_s19 = scalar_lea.vmem %s895_s12, 256  ;;  %s1076_s21 = scalar_lea.vmem %s1075_s20, 512 }
  0x1b   : > { %485 = vperm.xlu1 %1054, %v316_v1   ;;  %v562_v23 = vld [vmem:[%s1459_s4] sm:$0xff]  ;;  %v568_v24 = vld [vmem:[%s1459_s4 + $0x30] sm:$0xff]  ;;  %v563_v26 = vld [vmem:[%s1459_s4 + $0x8] sm:$0xff]  ;;  %p1071_p12 = scmp.ne.s32.totalorder %s895_s12, %s1070_s19  ;;  %p1077_p1 = scmp.lt.s32.totalorder %s895_s12, %s1075_s20 }
  0x1c   : > { %v765_v27 = vld [vmem:[%s1461_s6] sm:$0xff]  ;;  %p1078_p2 = scmp.lt.s32.totalorder %s1076_s21, %s1070_s19 }
  0x1d   : > { %v308_v32 = vld [vmem:[%s305_s17] sm:$0xf]  ;;  %s892_s17 = scalar_lea.hbm %s1462_s7, %s993_s8  ;;  %p1072_p13 = pnand %p1071_p12, %p1232_p4 }
  0x1e   : > { %352 = vperm.xlu0 %1052, %v314_v5   ;;  %v369_v33 = vrot.slane %v308_v32, %v368_v30  ;;  %v373_v34 = vrot.slane %v308_v32, %v372_v31  ;;  %v491_v39 = vrot.slane %v308_v32, %v490_v35  ;;  %v495_v40 = vrot.slane %v308_v32, %v494_v36  ;;  %p1079_p3 = por %p1078_p2, %p1077_p1 }
  0x1f   : > { %1055 = vset.pattern.permute.xlu1 %v1148_v2  ;;  %p1073_p0 = pneg %p1072_p13 }
  0x20   : > { %432 = vperm.xlu1 %1055, %v323_v6   ;;  %v1329_v37 = vrot.slane %v369_v33, %v368_v30  ;;  %v1331_v38 = vrot.slane %v373_v34, %v368_v30  ;;  %v1335_v45 = vrot.slane %v491_v39, %v490_v35  ;;  %v1337_v46 = vrot.slane %v495_v40, %v490_v35 }
  0x21   : > { %p1080_p5 = pnand %p1079_p3, %p1073_p0 }
  0x22   : > { %422 = vperm.xlu0 %1052, %v321_v7  }
  0x24   : > { %347 = vperm.xlu1 %1055, %v313_v8  }
  0x26   : > { %417 = vperm.xlu0 %1052, %v320_v9  }
  0x28   : > { %427 = vperm.xlu1 %1055, %v322_v10  }
  0x2a   : > { %332 = vperm.xlu0 %1052, %v310_v11  }
  0x2c   : > { %342 = vperm.xlu1 %1055, %v312_v12  }
  0x2e   : > { %1059 = vset.pattern.permute.xlu0 %v1149_v4 }
  0x2f   : > { %481 = vperm.xlu0 %1059, %v315_v3  }
  0x30   : > { %1056 = vset.pattern.permute.xlu1 %v1149_v4 }
  0x31   : > { %473 = vperm.xlu1 %1056, %v313_v8  }
  0x33   : > { %477 = vperm.xlu0 %1059, %v314_v5  }
  0x35   : > { %1057 = vset.pattern.permute.xlu1 %v1148_v2 }
  0x36   : > { %337 = vperm.xlu1 %1057, %v311_v13  }
  0x37   : > { %465 = vperm.xlu0 %1059, %v311_v13  }
  0x3a   : > { %1058 = vset.pattern.permute.xlu1 %v1149_v4 }
  0x3b   : > { %469 = vperm.xlu1 %1058, %v312_v12   ;;  %461 = vperm.xlu0 %1059, %v310_v11  }
  0x3f   : > { %1060 = vset.pattern.permute.xlu1 %v1148_v2  ;;  %457 = vperm.xlu0 %1059, %v309_v14  }
  0x40   : > { %412 = vperm.xlu1 %1060, %v319_v15  }
  0x43   : > { %1061 = vset.pattern.permute.xlu0 %v1148_v2 }
  0x44   : > { %327 = vperm.xlu1 %1060, %v309_v14   ;;  %602 = vperm.xlu0 %1061, %v568_v24  }
  0x48   : > { %407 = vperm.xlu1 %1060, %v318_v16   ;;  %587 = vperm.xlu0 %1061, %v565_v25  }
  0x4c   : > { %402 = vperm.xlu1 %1060, %v317_v17   ;;  %577 = vperm.xlu0 %1061, %v563_v26  }
  0x50   : > { %607 = vperm.xlu1 %1060, %v569_v18   ;;  %768 = vperm.xlu0 %1061, %v765_v27  }
  0x54   : > { %597 = vperm.xlu1 %1060, %v567_v20  }
  0x58   : > { %592 = vperm.xlu1 %1060, %v566_v21  }
  0x5c   : > { %582 = vperm.xlu1 %1060, %v564_v22  }
  0x60   : > { %572 = vperm.xlu1 %1060, %v562_v23  }
  0x91   : > { %v438_v41 = vpop.permute.xlu1 %437  ;;  %v363_v42 = vpop.permute.xlu0 %362 }
  0x92   : > { %v398_v43 = vmul.f32 %v1329_v37, %v363_v42  ;;  %v399_v44 = vmul.f32 %v1331_v38, %v363_v42 }
  0x94   : > { %v454_v49 = vadd.f32 %v438_v41, %v398_v43  ;;  %v455_v52 = vadd.f32 %v438_v41, %v399_v44 }
  0x95   : > { %v358_v47 = vpop.permute.xlu0 %357 }
  0x96   : > { %v486_v48 = vpop.permute.xlu1 %485  ;;  %v396_v0 = vmul.f32 %v1329_v37, %v358_v47  ;;  %v397_v1 = vmul.f32 %v1331_v38, %v358_v47 }
  0x97   : > { %v520_v50 = vmul.f32 %v1335_v45, %v486_v48  ;;  %v521_v51 = vmul.f32 %v1337_v46, %v486_v48 }
  0x99   : > { %v353_v53 = vpop.permute.xlu0 %352  ;;  %v537_v54 = vadd.f32 %v521_v51, %v455_v52  ;;  %v536_v55 = vadd.f32 %v520_v50, %v454_v49 }
  0x9a   : > { %v394_v9 = vmul.f32 %v1329_v37, %v353_v53  ;;  %v395_v12 = vmul.f32 %v1331_v38, %v353_v53 }
  0x9b   : > { %v433_v56 = vpop.permute.xlu1 %432  ;;  %v553_v57 = vmax.f32 %v537_v54, 0.0  ;;  %v552_v58 = vmax.f32 %v536_v55, 0.0 }
  0x9c   : > { %v452_v5 = vadd.f32 %v433_v56, %v396_v0  ;;  %v453_v6 = vadd.f32 %v433_v56, %v397_v1 }
  0x9d   : > { %v423_v59 = vpop.permute.xlu0 %422  ;;  %651 = vmatprep.subr.mxu0 %v553_v57 }
  0x9e   : > { %652 = vmatpush1.msra.mxu0 %v552_v58 }
  0x9f   : > { %v348_v60 = vpop.permute.xlu1 %347 }
  0xa0   : > { %v393_v3 = vmul.f32 %v1331_v38, %v348_v60  ;;  %v392_v10 = vmul.f32 %v1329_v37, %v348_v60 }
  0xa1   : > { %v418_v61 = vpop.permute.xlu0 %417 }
  0xa2   : > { %v449_v16 = vadd.f32 %v423_v59, %v393_v3  ;;  %v448_v24 = vadd.f32 %v423_v59, %v392_v10 }
  0xa3   : > { %v428_v62 = vpop.permute.xlu1 %427 }
  0xa4   : > { %v450_v20 = vadd.f32 %v428_v62, %v394_v9  ;;  %v451_v21 = vadd.f32 %v428_v62, %v395_v12 }
  0xa5   : > { %v1341_v63 = vpop.permute.xlu0 %332 }
  0xa6   : > { %v387_v3 = vmul.f32 %v1331_v38, %v1341_v63 }
  0xa7   : > { %v343_v2 = vpop.permute.xlu1 %342 }
  0xa8   : > { %v390_v32 = vmul.f32 %v1329_v37, %v343_v2  ;;  %v391_v33 = vmul.f32 %v1331_v38, %v343_v2  ;;  %v386_v2 = vmul.f32 %v1329_v37, %v1341_v63 }
  0xaa   : > { %v482_v4 = vpop.permute.xlu0 %481  ;;  %v446_v41 = vadd.f32 %v418_v61, %v390_v32  ;;  %v447_v42 = vadd.f32 %v418_v61, %v391_v33 }
  0xab   : > { %v518_v7 = vmul.f32 %v1335_v45, %v482_v4  ;;  %v519_v8 = vmul.f32 %v1337_v46, %v482_v4 }
  0xac   : > { %v474_v11 = vpop.permute.xlu1 %473 }
  0xad   : > { %v534_v13 = vadd.f32 %v518_v7, %v452_v5  ;;  %v535_v14 = vadd.f32 %v519_v8, %v453_v6  ;;  %v515_v15 = vmul.f32 %v1337_v46, %v474_v11  ;;  %v514_v17 = vmul.f32 %v1335_v45, %v474_v11 }
  0xae   : > { %v478_v18 = vpop.permute.xlu0 %477 }
  0xaf   : > { %v516_v22 = vmul.f32 %v1335_v45, %v478_v18  ;;  %v517_v23 = vmul.f32 %v1337_v46, %v478_v18  ;;  %v551_v25 = vmax.f32 %v535_v14, 0.0  ;;  %v550_v26 = vmax.f32 %v534_v13, 0.0 }
  0xb0   : > { %v531_v27 = vadd.f32 %v515_v15, %v449_v16  ;;  %v530_v31 = vadd.f32 %v514_v17, %v448_v24 }
  0xb1   : > { %v532_v28 = vadd.f32 %v516_v22, %v450_v20  ;;  %v533_v29 = vadd.f32 %v517_v23, %v451_v21  ;;  %v338_v30 = vpop.permute.xlu1 %337  ;;  %653 = vmatprep.subr.mxu0 %v551_v25  ;;  %v558_v25 = vld [vmem:[%s1458_s3 + $0x20] sm:$0xff] }
  0xb2   : > { %654 = vmatpush1.msra.mxu0 %v550_v26  ;;  %v547_v36 = vmax.f32 %v531_v27, 0.0  ;;  %v546_v40 = vmax.f32 %v530_v31, 0.0  ;;  %v466_v47 = vpop.permute.xlu0 %465  ;;  %v388_v50 = vmul.f32 %v1329_v37, %v338_v30  ;;  %v389_v51 = vmul.f32 %v1331_v38, %v338_v30  ;;  %v559_v26 = vld [vmem:[%s1458_s3 + $0x28] sm:$0xff]  ;;  %v560_v27 = vld [vmem:[%s1458_s3 + $0x30] sm:$0xff] }
  0xb3   : > { %v549_v34 = vmax.f32 %v533_v29, 0.0  ;;  %v548_v35 = vmax.f32 %v532_v28, 0.0  ;;  %v510_v55 = vmul.f32 %v1335_v45, %v466_v47  ;;  %v511_v56 = vmul.f32 %v1337_v46, %v466_v47  ;;  %v561_v28 = vld [vmem:[%s1458_s3 + $0x38] sm:$0xff] }
  0xb5   : > { %655 = vmatprep.subr.mxu0 %v549_v34 }
  0xb6   : > { %v470_v39 = vpop.permute.xlu1 %469  ;;  %656 = vmatpush1.msra.mxu0 %v548_v35  ;;  %v462_v59 = vpop.permute.xlu0 %461 }
  0xb7   : > { %v512_v43 = vmul.f32 %v1335_v45, %v470_v39  ;;  %v513_v44 = vmul.f32 %v1337_v46, %v470_v39  ;;  %657 = vmatprep.subr.mxu0 %v547_v36  ;;  %v508_v5 = vmul.f32 %v1335_v45, %v462_v59  ;;  %v509_v6 = vmul.f32 %v1337_v46, %v462_v59 }
  0xb8   : > { %658 = vmatpush1.msra.mxu0 %v546_v40 }
  0xb9   : > { %v528_v48 = vadd.f32 %v512_v43, %v446_v41  ;;  %v529_v49 = vadd.f32 %v513_v44, %v447_v42 }
  0xba   : > { %v458_v7 = vpop.permute.xlu0 %457 }
  0xbb   : > { %v413_v52 = vpop.permute.xlu1 %412  ;;  %v545_v53 = vmax.f32 %v529_v49, 0.0  ;;  %v544_v54 = vmax.f32 %v528_v48, 0.0  ;;  %v506_v14 = vmul.f32 %v1335_v45, %v458_v7  ;;  %v507_v63 = vmul.f32 %v1337_v46, %v458_v7  ;;  %v556_v45 = vld [vmem:[%s1458_s3 + $0x10] sm:$0xff]  ;;  %v557_v46 = vld [vmem:[%s1458_s3 + $0x18] sm:$0xff] }
  0xbc   : > { %v444_v57 = vadd.f32 %v413_v52, %v388_v50  ;;  %v445_v58 = vadd.f32 %v413_v52, %v389_v51 }
  0xbd   : > { %659 = vmatprep.subr.mxu0 %v545_v53 }
  0xbe   : > { %v526_v60 = vadd.f32 %v510_v55, %v444_v57  ;;  %v527_v61 = vadd.f32 %v511_v56, %v445_v58  ;;  %660 = vmatpush1.msra.mxu0 %v544_v54 }
  0xbf   : > { %v328_v62 = vpop.permute.xlu1 %327  ;;  %v603_v48 = vpop.permute.xlu0 %602 }
  0xc0   : > { %v543_v0 = vmax.f32 %v527_v61, 0.0  ;;  %v542_v1 = vmax.f32 %v526_v60, 0.0  ;;  %v384_v10 = vmul.f32 %v1329_v37, %v328_v62  ;;  %v385_v11 = vmul.f32 %v1331_v38, %v328_v62  ;;  %v554_v37 = vld [vmem:[%s1458_s3] sm:$0xff]  ;;  %v555_v38 = vld [vmem:[%s1458_s3 + $0x8] sm:$0xff] }
  0xc2   : > { %661 = vmatprep.subr.mxu0 %v543_v0 }
  0xc3   : > { %v408_v4 = vpop.permute.xlu1 %407  ;;  %662 = vmatpush1.msra.mxu0 %v542_v1  ;;  %v588_v56 = vpop.permute.xlu0 %587 }
  0xc4   : > { %v442_v8 = vadd.f32 %v408_v4, %v386_v2  ;;  %v443_v9 = vadd.f32 %v408_v4, %v387_v3 }
  0xc6   : > { %v524_v12 = vadd.f32 %v508_v5, %v442_v8  ;;  %v525_v13 = vadd.f32 %v509_v6, %v443_v9 }
  0xc7   : > { %v403_v15 = vpop.permute.xlu1 %402  ;;  %v578_v7 = vpop.permute.xlu0 %577 }
  0xc8   : > { %v440_v16 = vadd.f32 %v403_v15, %v384_v10  ;;  %v441_v17 = vadd.f32 %v403_v15, %v385_v11  ;;  %v541_v18 = vmax.f32 %v525_v13, 0.0  ;;  %v540_v20 = vmax.f32 %v524_v12, 0.0 }
  0xca   : > { %v522_v21 = vadd.f32 %v506_v14, %v440_v16  ;;  %v523_v22 = vadd.f32 %v507_v63, %v441_v17  ;;  %663 = vmatprep.subr.mxu0 %v541_v18 }
  0xcb   : > { %664 = vmatpush1.msra.mxu0 %v540_v20  ;;  %v608_v40 = vpop.permute.xlu1 %607 }
  0xcc   : > { %v539_v23 = vmax.f32 %v523_v22, 0.0  ;;  %v538_v24 = vmax.f32 %v522_v21, 0.0 }
  0xce   : > { %665 = vmatprep.subr.mxu0 %v539_v23 }
  0xcf   : > { %666 = vmatpush1.msra.mxu0 %v538_v24 }
  0xd0   : > { %978 = vmatmul.mubr.msk.f32.vlgmr.msra.gmra.mxu0 %vm610_vm0, %v554_v37  ;;  %v764_v37 = vld [vmem:[%s1460_s5] sm:$0xff] }
  0xd1   : > { %705 = vmatprep.mubr.f32.mxu0 %v1150_v19 }
  0xd4   : > { %979 = vmatmul.mubr.msk.f32.gmra.mxu0 %vm610_vm0, %v555_v38  ;;  %v769_v38 = vpop.permute.xlu0 %768 }
  0xd5   : > { %711 = vmatprep.mubr.f32.mxu0 %v1150_v19 }
  0xd8   : > { %980 = vmatmul.mubr.msk.f32.gmra.mxu0 %vm610_vm0, %v556_v45 }
  0xd9   : > { %717 = vmatprep.mubr.f32.mxu0 %v1150_v19 }
  0xdc   : > { %981 = vmatmul.mubr.msk.f32.gmra.mxu0 %vm610_vm0, %v557_v46 }
  0xdd   : > { %723 = vmatprep.mubr.f32.mxu0 %v1150_v19 }
  0xe0   : > { %982 = vmatmul.mubr.msk.f32.gmra.mxu0 %vm610_vm0, %v558_v25 }
  0xe1   : > { %729 = vmatprep.mubr.f32.mxu0 %v1150_v19 }
  0xe4   : > { %983 = vmatmul.mubr.msk.f32.gmra.mxu0 %vm610_vm0, %v559_v26 }
  0xe5   : > { %735 = vmatprep.mubr.f32.mxu0 %v1150_v19 }
  0xe8   : > { %984 = vmatmul.mubr.msk.f32.gmra.mxu0 %vm610_vm0, %v560_v27 }
  0xe9   : > { %741 = vmatprep.mubr.f32.mxu0 %v1150_v19  ;;  %v598_v19 = vpop.permute.xlu1 %597 }
  0xec   : > { %985 = vmatmul.mubr.msk.f32.gmra.mxu0 %vm610_vm0, %v561_v28 }
  0xed   : > { %v593_v50 = vpop.permute.xlu1 %592 }
  0xf1   : > { %v583_v0 = vpop.permute.xlu1 %582 }
  0xf5   : > { %v573_v14 = vpop.permute.xlu1 %572 }
 0x190   : > { %v701_v29 = vpop.f32.mrf.mxu0 }
 0x191   : > { %v702_v18 = vadd.f32 %v701_v29, %v573_v14 }
 0x192   : > { %v703_v30 = vpop.f32.mrf.mxu0 }
 0x193   : > { %v704_v16 = vadd.f32 %v703_v30, %v573_v14  ;;  %v748_v24 = vmax.f32 %v702_v18, 0.0 }
 0x194   : > { %v707_v31 = vpop.f32.mrf.mxu0 }
 0x195   : > { %v708_v63 = vadd.f32 %v707_v31, %v578_v7  ;;  %v749_v23 = vmax.f32 %v704_v16, 0.0 }
 0x196   : > { %v709_v32 = vpop.f32.mrf.mxu0 }
 0x197   : > { %v710_v12 = vadd.f32 %v709_v32, %v578_v7  ;;  %v750_v22 = vmax.f32 %v708_v63, 0.0 }
 0x198   : > { %v713_v33 = vpop.f32.mrf.mxu0 }
 0x199   : > { %v714_v10 = vadd.f32 %v713_v33, %v583_v0  ;;  %v751_v21 = vmax.f32 %v710_v12, 0.0 }
 0x19a   : > { %v715_v34 = vpop.f32.mrf.mxu0 }
 0x19b   : > { %v716_v8 = vadd.f32 %v715_v34, %v583_v0  ;;  %v752_v20 = vmax.f32 %v714_v10, 0.0 }
 0x19c   : > { %v719_v35 = vpop.f32.mrf.mxu0 }
 0x19d   : > { %v720_v5 = vadd.f32 %v719_v35, %v588_v56  ;;  %v753_v17 = vmax.f32 %v716_v8, 0.0 }
 0x19e   : > { %v721_v36 = vpop.f32.mrf.mxu0 }
 0x19f   : > { %v722_v3 = vadd.f32 %v721_v36, %v588_v56  ;;  %v754_v15 = vmax.f32 %v720_v5, 0.0 }
 0x1a0   : > { %v725_v39 = vpop.f32.mrf.mxu0 }
 0x1a1   : > { %v726_v1 = vadd.f32 %v725_v39, %v593_v50  ;;  %v755_v13 = vmax.f32 %v722_v3, 0.0 }
 0x1a2   : > { %v727_v41 = vpop.f32.mrf.mxu0 }
 0x1a3   : > { %v728_v61 = vadd.f32 %v727_v41, %v593_v50  ;;  %v756_v11 = vmax.f32 %v726_v1, 0.0 }
 0x1a4   : > { %v731_v42 = vpop.f32.mrf.mxu0 }
 0x1a5   : > { %v732_v59 = vadd.f32 %v731_v42, %v598_v19  ;;  %v757_v9 = vmax.f32 %v728_v61, 0.0 }
 0x1a6   : > { %v733_v43 = vpop.f32.mrf.mxu0 }
 0x1a7   : > { %v734_v57 = vadd.f32 %v733_v43, %v598_v19  ;;  %v758_v6 = vmax.f32 %v732_v59, 0.0 }
 0x1a8   : > { %v737_v44 = vpop.f32.mrf.mxu0 }
 0x1a9   : > { %v738_v55 = vadd.f32 %v737_v44, %v603_v48  ;;  %v759_v4 = vmax.f32 %v734_v57, 0.0 }
 0x1aa   : > { %v739_v47 = vpop.f32.mrf.mxu0 }
 0x1ab   : > { %v740_v53 = vadd.f32 %v739_v47, %v603_v48  ;;  %v760_v2 = vmax.f32 %v738_v55, 0.0 }
 0x1ac   : > { %v743_v49 = vpop.f32.mrf.mxu0 }
 0x1ad   : > { %v744_v51 = vadd.f32 %v743_v49, %v608_v40  ;;  %v761_v62 = vmax.f32 %v740_v53, 0.0 }
 0x1ae   : > { %v745_v52 = vpop.f32.mrf.mxu0 }
 0x1af   : > { %v746_v54 = vadd.f32 %v745_v52, %v608_v40  ;;  %v762_v60 = vmax.f32 %v744_v51, 0.0 }
 0x1b1   : > { %v763_v58 = vmax.f32 %v746_v54, 0.0 }
 0x1b3   : > { %790 = vmatprep.subr.mxu1 %v763_v58 }
 0x1b4   : > { %791 = vmatpush1.msra.mxu1 %v762_v60 }
 0x1b5   : > { %792 = vmatprep.subr.mxu1 %v761_v62 }
 0x1b6   : > { %793 = vmatpush1.msra.mxu1 %v760_v2 }
 0x1b7   : > { %794 = vmatprep.subr.mxu1 %v759_v4 }
 0x1b8   : > { %795 = vmatpush1.msra.mxu1 %v758_v6 }
 0x1b9   : > { %796 = vmatprep.subr.mxu1 %v757_v9 }
 0x1ba   : > { %797 = vmatpush1.msra.mxu1 %v756_v11 }
 0x1bb   : > { %798 = vmatprep.subr.mxu1 %v755_v13 }
 0x1bc   : > { %799 = vmatpush1.msra.mxu1 %v754_v15 }
 0x1bd   : > { %800 = vmatprep.subr.mxu1 %v753_v17 }
 0x1be   : > { %801 = vmatpush1.msra.mxu1 %v752_v20 }
 0x1bf   : > { %802 = vmatprep.subr.mxu1 %v751_v21 }
 0x1c0   : > { %803 = vmatpush1.msra.mxu1 %v750_v22 }
 0x1c1   : > { %804 = vmatprep.subr.mxu1 %v749_v23 }
 0x1c2   : > { %805 = vmatpush1.msra.mxu1 %v748_v24 }
 0x1c3   : > { %986 = vmatmul.mubr.msk.f32.vlgmr.msra.gmra.mxu1 %vm610_vm0, %v764_v37 }
 0x283   : > { %v840_v45 = vpop.f32.mrf.mxu1 }
 0x284   : > { %v841_v46 = vadd.f32 %v840_v45, %v769_v38 }
 0x285   : > { %v842_v25 = vpop.f32.mrf.mxu1 }
 0x286   : > { %v847_v26 = vmin.f32 %v841_v46, 20.0  ;;  %v843_v27 = vadd.f32 %v842_v25, %v769_v38  ;;  %vm845_vm2 = vcmp.gt.f32.partialorder %v841_v46, 20.0 }
 0x288   : > { %v849_v28 = vmul.f32 1.442695, %v847_v26  ;;  %v848_v29 = vmin.f32 %v843_v27, 20.0  ;;  %vm846_vm4 = vcmp.gt.f32.partialorder %v843_v27, 20.0 }
 0x28a   : > { %1062 = vpow2.f32 %v849_v28  ;;  %v851_v30 = vmul.f32 1.442695, %v848_v29 }
 0x28c   : > { %1064 = vpow2.f32 %v851_v30 }
 0x297   : > { %v1063_v31 = vpop.eup %1062 }
 0x298   : > { %v853_v32 = vadd.f32 1.0, %v1063_v31  ;;  %v856_v35 = vmul.f32 -0.5, %v1063_v31  ;;  %v859_v40 = vand.u32 2147483647, %v1063_v31 }
 0x299   : > { %v1065_v33 = vpop.eup %1064 }
 0x29a   : > { %1066 = vlog2.f32 %v853_v32  ;;  %v862_v34 = vadd.f32 1.0, %v1065_v33  ;;  %v865_v36 = vmul.f32 -0.5, %v1065_v33  ;;  %v857_v39 = vadd.f32 1.0, %v856_v35 }
 0x29b   : > { %v868_v43 = vand.u32 2147483647, %v1065_v33  ;;  %vm860_vm1 = vcmp.lt.f32.partialorder %v859_v40, 0.0004427343 }
 0x29c   : > { %1068 = vlog2.f32 %v862_v34  ;;  %v866_v41 = vadd.f32 1.0, %v865_v36  ;;  %v858_v44 = vmul.f32 %v1063_v31, %v857_v39 }
 0x29d   : > { %vm869_vm3 = vcmp.lt.f32.partialorder %v868_v43, 0.0004427343 }
 0x29e   : > { %v867_v50 = vmul.f32 %v1065_v33, %v866_v41 }
 0x2a7   : > { %v1067_v42 = vpop.eup %1066 }
 0x2a8   : > { %v855_v19 = vmul.f32 0.6931472, %v1067_v42 }
 0x2a9   : > { %v1069_v47 = vpop.eup %1068 }
 0x2aa   : > { %v861_v48 = vsel %vm860_vm1, %v858_v44, %v855_v19  ;;  %v864_v49 = vmul.f32 0.6931472, %v1069_v47 }
 0x2ab   : > { %v871_v51 = vsel %vm845_vm2, %v841_v46, %v861_v48 }
 0x2ac   : > { %v873_v52 = vadd.f32 1e-06, %v871_v51  ;;  %v870_v53 = vsel %vm869_vm3, %v867_v50, %v864_v49 }
 0x2ad   : > { %v872_v54 = vsel %vm846_vm4, %v843_v27, %v870_v53 }
 0x2ae   : > { %v874_v55 = vadd.f32 1e-06, %v872_v54  ;;  %875 = vst [vmem:[%s296_s10] sm:$0xff] %v873_v52 }
 0x2b0   : > { %876 = vst [vmem:[%s296_s10 + $0x8] sm:$0xff] %v874_v55 }
 0x2b1   : > { %1083 = shalt.err (!%p1080_p5)
}
 0x2b2   : > { %s1084_s22 = scalar_lea.hbm %s892_s17, 256  ;;  %s1088_s8 = scalar_lea.hbm %s1462_s7, 512 }
 0x2b3   : > { %p1085_p6 = scmp.ne.s32.totalorder %s892_s17, %s1084_s22  ;;  %p1089_p10 = scmp.lt.s32.totalorder %s892_s17, %s1462_s7 }
 0x2b4   : > { %p1090_p11 = scmp.lt.s32.totalorder %s1088_s8, %s1084_s22 }
 0x2b5   : > { %p1086_p7 = pnand %p1085_p6, %p1232_p4 }
 0x2b6   : > { %p1091_p12 = por %p1090_p11, %p1089_p10 }
 0x2b7   : > { %p1087_p9 = pneg %p1086_p7 }
 0x2b9   : > { %p1092_p13 = pnand %p1091_p12, %p1087_p9 }
 0x2bb   : > { %1095 = shalt.err (!%p1092_p13)
}
 0x2bc   : > { %994 = dma.vmem_to_hbm [thread:$0]  (%p1232_p4), %s895_s12, 256, %s892_s17, %s878_s18  }
 0x2bd PF: > { %p1000_p0 = scmp.ge.s32.totalorder %s1146_s29, 2  ;;  %s906_s16 = sand.u32 1, %s1126_s24  }
 0x2be   : > { %s907_s19 = scalar_lea.sflag [#allocation3], %s906_s16 }
 0x2bf   : > { %p997_p1 = pnand %p1000_p0, %p1239_p8 }
 0x2c1   : > { %p998_p2 = pneg %p997_p1 }
 0x2c3   : > { %1121 = dma.done.wait (%p998_p2), %s907_s19, 256  }
 0x2c4   : > { %1123 = vsyncadd (%p998_p2), %s907_s19, 4294967040  ;;  %s20_s29 = sadd.s32 1, %s1146_s29   ;;  %s1465_s24 = smov %s1130_s25 }
 0x2c5   : > { %p17_p3 = scmp.ge.s32.totalorder %s20_s29, 4   ;;  %s1466_s25 = smov %s1134_s26 }
 0x2c6   : > { %s1467_s26 = smov %s1245_s14  ;;  %s1468_s27 = smov %s1142_s28 }
 0x2c7   : > { %s1469_s28 = smov %s1471_s9  ;;  %19 = sbr.rel (!%p17_p3) target bundleno = 4 (0x4), region = 83 }
 0x2cc   :  { %912 = vsyncpa [#allocation3], 1 }
 0x2cd   :  { %914 = vsyncpa [#allocation3 + $0x1], 1 }

</bundles_post_ra>
